<compile_context>
chip_gen: v6e
topology: v6e:2x2x1
jax: 0.10.0
libtpu: 0.0.40
codegen_flags: <defaults>
</compile_context>

<pallas_src>
import jax
import jax.numpy as jnp
from jax.experimental import pallas as pl
from jax.experimental.pallas import tpu as pltpu


def _identity_kernel(x_ref, o_ref):
    # Elementwise copy of the current VMEM tile.
    o_ref[...] = x_ref[...]


def _lane_dense_factorization(total):
    """Pick (R, C) with C a multiple of 128 that divides `total`, or None."""
    for c in (2048, 1024, 512, 256, 128):
        if total % c == 0:
            return total // c, c
    return None


def _identity_2d(x2):
    R, C = x2.shape
    # Tile cap: (512, 1024). min(dim, cap) is always a legal block shape:
    # either the full dimension, or a multiple of (8, 128). Ragged trailing
    # blocks produced by pl.cdiv are handled automatically.
    tr = min(R, 512)
    tc = min(C, 1024)
    grid = (pl.cdiv(R, tr), pl.cdiv(C, tc))

    return pl.pallas_call(
        _identity_kernel,
        out_shape=jax.ShapeDtypeStruct((R, C), x2.dtype),
        grid_spec=pl.GridSpec(
            grid=grid,
            in_specs=[pl.BlockSpec((tr, tc), lambda i, j: (i, j))],
            out_specs=pl.BlockSpec((tr, tc), lambda i, j: (i, j)),
        ),
        # Pass-through: reuse the input buffer for the output (no new HBM alloc).
        input_output_aliases={0: 0},
        compiler_params=pltpu.CompilerParams(
            dimension_semantics=("parallel", "parallel"),
        ),
    )(x2)


@jax.jit
def identity(x):
    """Identity forward pass via a Pallas TPU kernel (accepts any rank)."""
    total = x.size
    if total == 0:
        return x

    fac = _lane_dense_factorization(total)
    if fac is not None:
        x2 = x.reshape(fac)                 # lane-dense (R, C), C % 128 == 0
    elif x.ndim >= 2:
        x2 = x.reshape(-1, x.shape[-1])     # ragged fallback
    else:
        x2 = x.reshape(1, -1)

    out = _identity_2d(x2)
    return out.reshape(x.shape)


if __name__ == "__main__":
    key = jax.random.PRNGKey(0)
    # Small NCHW-style input consistent with an audio/vision pass-through.
    x = jax.random.normal(key, (2, 4, 16, 16), dtype=jnp.float32)

    y = identity(x)
    y = jax.block_until_ready(y)

    assert y.shape == x.shape
    assert y.dtype == x.dtype
    assert bool(jnp.all(y == x))

    print("KERNEL_OK")
</pallas_src>

<mosaic_0001>
module attributes {stable_mosaic.version = 11 : i64} {
  func.func @_identity_kernel(%arg0: i32, %arg1: i32, %arg2: memref<1x1024xf32, #tpu.memory_space<vmem>>, %arg3: memref<1x1024xf32, #tpu.memory_space<vmem>>) attributes {dimension_semantics = [#tpu.dimension_semantics<parallel>, #tpu.dimension_semantics<parallel>], iteration_bounds = array<i64: 1, 2>, scalar_prefetch = 0 : i64, scratch_operands = 0 : i64, tpu.core_type = #tpu.core_type<tc>, window_params = [{transform_indices = @transform_0, window_bounds = array<i64: 1, 1024>}, {transform_indices = @transform_1, window_bounds = array<i64: 1, 1024>}]} {
    %c0 = arith.constant 0 : index
    %c0_0 = arith.constant 0 : index
    %0 = vector.load %arg2[%c0, %c0_0] : memref<1x1024xf32, #tpu.memory_space<vmem>>, vector<1x1024xf32>
    %c0_1 = arith.constant 0 : index
    %c0_2 = arith.constant 0 : index
    %1 = vector.load %arg3[%c0_1, %c0_2] : memref<1x1024xf32, #tpu.memory_space<vmem>>, vector<1x1024xf32>
    tpu.vector_store %arg3[%c0_1, %c0_2], %0 {strides = array<i32>} : memref<1x1024xf32, #tpu.memory_space<vmem>>, vector<1x1024xf32>,
    return
  }
  func.func @transform_0(%arg0: i32, %arg1: i32) -> (i32, i32) {
    %c0_i32 = arith.constant 0 : i32
    return %arg0, %arg1 : i32, i32
  }
  func.func @transform_1(%arg0: i32, %arg1: i32) -> (i32, i32) {
    %c0_i32 = arith.constant 0 : i32
    return %arg0, %arg1 : i32, i32
  }
}

</mosaic_0001>

<bundles_post_ra>
// kernel: identity.1
= control target key start
LH: loop header
LB: loop body
LE: loop exit
PB: predicated region body
PF: predicated region fallthrough
CT: control target
= control target key end

     0   :  { %s276_s6 = smov 0   ;;  %s280_s7 = smov 0   ;;  %s304_s0 = inlined_call_operand.vmem [shape: f32[1,2048], index: 0, kind: input, shape index: {}, may-alias: {0,1}]   ;;  %s305_s1 = inlined_call_operand.vmem [shape: f32[1,2048], index: 1, kind: output, shape index: {}, may-alias: {0,1}]  }
   0x1   :  { %s284_s8 = smov 0  }
   0x2 LB: > { %s20_s9 = sadd.s32 1, %s282_s7  ;;  %p235_p0 = scmp.ge.s32.totalorder %s286_s8, 1  ;;  %s286_s8 = sphi %s284_s8, %s11_s8   ;;  %s282_s7 = sphi %s280_s7, %s281_s7   ;;  %s278_s6 = sphi %s276_s6, %s277_s6  }
   0x3   : > { %p21_p1 = scmp.ge.s32.totalorder %s20_s9, 2  ;;  %p107_p2 = scmp.lt.s32.totalorder %s286_s8, 3 }
   0x5   : > { %s307_s9 = smov (%p21_p1, %s20_s9), 0  ;;  %p108_p3 = pnand %p235_p0, %p107_p2 }
   0x6   : > { %s236_s10 = sshll.u32 (!%p108_p3), %s278_s6, 3 }
   0x7   : > { %111 = sbr.rel (%p108_p3) target bundleno = 16 (0x10), region = 24  ;;  %p136_p4 = scmp.lt.s32.totalorder (!%p108_p3), %s236_s10, 15 }
   0xc   : > { %s309_s10 = smov (!%p136_p4, %s236_s10), 15 }
   0xd   : > { %s140_s13 = scalar_lea.vmem %s304_s0, %s309_s10  ;;  %s149_s16 = scalar_lea.vmem %s305_s1, %s309_s10 }
   0xe   : > { %v151_v0 = vld [vmem:[%s140_s13] sm:$0xff] }
   0xf   : > { %152 = vst [vmem:[%s149_s16] sm:$0xff] %v151_v0 }
  0x10 PF: > { %s11_s8 = sadd.s32 1, %s286_s8   ;;  %s277_s6 = smov %s282_s7  }
  0x11   : > { %p8_p5 = scmp.ge.s32.totalorder %s11_s8, 4   ;;  %s281_s7 = smov %s307_s9  }
  0x13   :  { %10 = sbr.rel (!%p8_p5) target bundleno = 2 (0x2), region = 54 }

</bundles_post_ra>
